<compile_context>
chip_gen: v7x
topology: tpu7x:2x2x1
jax: 0.10.0
libtpu: 0.0.40
codegen_flags: <defaults>
</compile_context>

<pallas_src>
import functools

import jax
import jax.numpy as jnp
from jax.experimental import pallas as pl
from jax.experimental.pallas import tpu as pltpu


C_IN = 3        # conv1 input channels
C_HID = 4       # conv1..conv3 output channels
C_OUT = 3       # num_primary

# Cap so double-buffered in+out blocks stay well under ~16 MiB (v7x-safe).
MAX_TILE_ROWS = 2720


# ----------------------------------------------------------------------------
# Kernel: per-pixel channel MLP, fully on the VPU.
#   h1 = relu(W1^T x + b1); h2 = relu(W2^T h1 + b2); h3 = relu(W3^T h2 + b3)
#   out = W4^T h3 + b4 + x   (residual over the first num_primary channels;
#                             num_primary == C_in == 3 so that is all of them)
# x_ref / o_ref: (C, TILE_R, 128) VMEM blocks -- each channel is a dense slab.
# w*_ref: (Cin, Cout) f32 in SMEM;  b*_ref: (Cout,) f32 in SMEM.
# ----------------------------------------------------------------------------
def pronet_kernel(x_ref, w1_ref, b1_ref, w2_ref, b2_ref, w3_ref, b3_ref,
                  w4_ref, b4_ref, o_ref, *, compute_dtype):
    x_f32 = [x_ref[c] for c in range(C_IN)]              # 3 x (TILE_R, 128) f32
    if compute_dtype != jnp.float32:
        h = [v.astype(compute_dtype) for v in x_f32]
    else:
        h = x_f32

    def mix(inputs, w_ref, b_ref, n_out, relu):
        outs = []
        for co in range(n_out):
            acc = inputs[0] * w_ref[0, co].astype(compute_dtype)
            for ci in range(1, len(inputs)):
                acc = acc + inputs[ci] * w_ref[ci, co].astype(compute_dtype)
            acc = acc + b_ref[co].astype(compute_dtype)
            if relu:
                acc = jnp.maximum(acc, 0.0)
            outs.append(acc)
        return outs

    h = mix(h, w1_ref, b1_ref, C_HID, True)
    h = mix(h, w2_ref, b2_ref, C_HID, True)
    h = mix(h, w3_ref, b3_ref, C_HID, True)
    res = mix(h, w4_ref, b4_ref, C_OUT, False)

    # Residual (kept in f32) + dense full-width stores, one (TILE_R,128) slab
    # per channel.  num_primary == C_in == 3 here, so this covers every output
    # channel; a channel guard would be needed only if num_primary > C_in.
    for c in range(C_OUT):
        o_ref[c] = res[c].astype(jnp.float32) + x_f32[c]


@functools.partial(jax.jit, static_argnames=("tile_rows", "compute_dtype"))
def pronet_forward(x_nchw, params, *, tile_rows=1024, compute_dtype=jnp.float32):
    """x_nchw: (B, 3, H, W) float32. Returns (B, 3, H, W) float32."""
    w1, b1, w2, b2, w3, b3, w4, b4 = params
    B, C, H, W = x_nchw.shape
    assert C == C_IN

    P = H * W
    P128 = -(-P // 128) * 128
    x3 = x_nchw.reshape(B, C, P)                         # free reshape
    if P128 != P:
        # TODO(synk): only taken when H*W % 128 != 0 (one extra HBM pass);
        # the module's intended image sizes (e.g. 1024x1536) never hit this.
        x3 = jnp.pad(x3, ((0, 0), (0, 0), (0, P128 - P)))
    R = P128 // 128
    x4 = x3.reshape(B, C, R, 128)                        # free reshape

    # Row tile: sublane-dense (multiple of 8) or the full extent; VMEM-capped.
    if R <= tile_rows:
        tr = R                                           # full extent: always legal
    else:
        tr = max(8, (min(tile_rows, MAX_TILE_ROWS) // 8) * 8)
    n_tiles = pl.cdiv(R, tr)
    # Keep both v7x TensorCores busy even when B == 1.
    if B * n_tiles < 2 and R >= 16:
        tr = max(8, ((R + 1) // 2 // 8) * 8)
        n_tiles = pl.cdiv(R, tr)

    grid = (B, n_tiles)                                  # uneven tail clipped by Pallas

    x_spec = pl.BlockSpec((None, C_IN, tr, 128), lambda b, r: (b, 0, r, 0))
    o_spec = pl.BlockSpec((None, C_OUT, tr, 128), lambda b, r: (b, 0, r, 0))
    smem_spec = pl.BlockSpec(memory_space=pltpu.MemorySpace.SMEM)

    out4 = pl.pallas_call(
        functools.partial(pronet_kernel, compute_dtype=compute_dtype),
        out_shape=jax.ShapeDtypeStruct((B, C_OUT, R, 128), jnp.float32),
        grid=grid,
        in_specs=[x_spec] + [smem_spec] * 8,
        out_specs=o_spec,
        compiler_params=pltpu.CompilerParams(
            dimension_semantics=("parallel", "parallel")),
    )(x4, w1, b1, w2, b2, w3, b3, w4, b4)

    out3 = out4.reshape(B, C_OUT, P128)                  # free reshape
    if P128 != P:
        out3 = out3[:, :, :P]
    return out3.reshape(B, C_OUT, H, W)                  # free reshape


# ----------------------------------------------------------------------------
# Deterministic parameter construction (plain-JAX glue, matches __init__):
# Conv2d(Cin, Cout, 1x1) weight (Cout, Cin, 1, 1) is a channel matmul, stored
# as (Cin, Cout).  spectral_norm divides the (Cout, Cin) weight by its largest
# singular value (exact SVD here; PyTorch uses power iteration).
# Xavier-normal init, biases filled with 1e-5.
# ----------------------------------------------------------------------------
def make_params(key):
    def xavier_normal(key, cout, cin):
        std = (2.0 / (cin + cout)) ** 0.5                # fan_in = cin, fan_out = cout
        return std * jax.random.normal(key, (cout, cin), dtype=jnp.float32)

    def spectral_normalize(w_oc_ic):
        sigma = jnp.linalg.svd(w_oc_ic, compute_uv=False)[0]
        return w_oc_ic / sigma

    shapes = [(C_HID, C_IN), (C_HID, C_HID), (C_HID, C_HID), (C_OUT, C_HID)]
    keys = jax.random.split(key, len(shapes))
    params = []
    for k, (cout, cin) in zip(keys, shapes):
        w = spectral_normalize(xavier_normal(k, cout, cin))   # (Cout, Cin)
        params.append(jnp.transpose(w))                       # (Cin, Cout)
        params.append(jnp.full((cout,), 1e-5, dtype=jnp.float32))
    return tuple(params)


# Pure-JAX reference (NCHW) for the correctness check.
def pronet_ref(x_nchw, params):
    w1, b1, w2, b2, w3, b3, w4, b4 = params

    def conv1x1(h, w, b):                                # w: (Cin, Cout), b: (Cout,)
        return jnp.einsum("bchw,cd->bdhw", h, w) + b[None, :, None, None]

    h = jax.nn.relu(conv1x1(x_nchw, w1, b1))
    h = jax.nn.relu(conv1x1(h, w2, b2))
    h = jax.nn.relu(conv1x1(h, w3, b3))
    res = conv1x1(h, w4, b4)
    return res + x_nchw                                  # num_primary == C_in == 3


if __name__ == "__main__":
    key = jax.random.PRNGKey(0)
    kp, kx = jax.random.split(key)
    params = make_params(kp)

    # 1) Small single-tile case: batch=2, 3 channels, 16x16 (P=256 -> R=2).
    x = jax.random.normal(kx, (2, 3, 16, 16), dtype=jnp.float32)
    out = jax.block_until_ready(pronet_forward(x, params))
    ref = pronet_ref(x, params)
    assert out.shape == (2, 3, 16, 16)
    assert jnp.allclose(out, ref, atol=1e-5, rtol=1e-5), "f32 mismatch vs reference"

    # 2) Multi-tile path with an uneven last tile (R=36, TILE_R=16 -> 3 tiles).
    x_big = jax.random.normal(kx, (1, 3, 48, 96), dtype=jnp.float32)
    out_big = jax.block_until_ready(pronet_forward(x_big, params, tile_rows=16))
    ref_big = pronet_ref(x_big, params)
    assert jnp.allclose(out_big, ref_big, atol=1e-5, rtol=1e-5), "tiled mismatch"

    # 3) H*W % 128 != 0 fallback (pad/slice branch).
    x_odd = jax.random.normal(kx, (1, 3, 5, 5), dtype=jnp.float32)
    out_odd = jax.block_until_ready(pronet_forward(x_odd, params))
    ref_odd = pronet_ref(x_odd, params)
    assert jnp.allclose(out_odd, ref_odd, atol=1e-5, rtol=1e-5), "pad-path mismatch"

    # 4) bf16 VPU compute path (v6e/v7x option); residual/store stay f32, so
    #    only the channel-mix numerics loosen (~1e-2 level).
    out_bf16 = jax.block_until_ready(
        pronet_forward(x, params, compute_dtype=jnp.bfloat16))
    assert jnp.allclose(out_bf16, ref, atol=1e-1, rtol=1e-1), "bf16 mismatch"

    print("KERNEL_OK")
</pallas_src>

<mosaic_0001>
module attributes {stable_mosaic.version = 11 : i64} {
  func.func @pronet_kernel(%arg0: i32, %arg1: i32, %arg2: memref<1x3x2x128xf32, #tpu.memory_space<vmem>>, %arg3: memref<3x4xf32, #tpu.memory_space<smem>>, %arg4: memref<4xf32, #tpu.memory_space<smem>>, %arg5: memref<4x4xf32, #tpu.memory_space<smem>>, %arg6: memref<4xf32, #tpu.memory_space<smem>>, %arg7: memref<4x4xf32, #tpu.memory_space<smem>>, %arg8: memref<4xf32, #tpu.memory_space<smem>>, %arg9: memref<4x3xf32, #tpu.memory_space<smem>>, %arg10: memref<3xf32, #tpu.memory_space<smem>>, %arg11: memref<1x3x2x128xf32, #tpu.memory_space<vmem>>) attributes {dimension_semantics = [#tpu.dimension_semantics<parallel>, #tpu.dimension_semantics<parallel>], iteration_bounds = array<i64: 2, 1>, scalar_prefetch = 0 : i64, scratch_operands = 0 : i64, tpu.core_type = #tpu.core_type<tc>, window_params = [{transform_indices = @transform_0, window_bounds = array<i64: 1, 3, 2, 128>}, {transform_indices = @transform_1, window_bounds = array<i64: 3, 4>}, {transform_indices = @transform_2, window_bounds = array<i64: 4>}, {transform_indices = @transform_3, window_bounds = array<i64: 4, 4>}, {transform_indices = @transform_4, window_bounds = array<i64: 4>}, {transform_indices = @transform_5, window_bounds = array<i64: 4, 4>}, {transform_indices = @transform_6, window_bounds = array<i64: 4>}, {transform_indices = @transform_7, window_bounds = array<i64: 4, 3>}, {transform_indices = @transform_8, window_bounds = array<i64: 3>}, {transform_indices = @transform_9, window_bounds = array<i64: 1, 3, 2, 128>}]} {
    %c0 = arith.constant 0 : index
    %c0_0 = arith.constant 0 : index
    %c0_1 = arith.constant 0 : index
    %c0_2 = arith.constant 0 : index
    %0 = vector.load %arg2[%c0, %c0_0, %c0_1, %c0_2] : memref<1x3x2x128xf32, #tpu.memory_space<vmem>>, vector<1x1x2x128xf32>
    %1 = vector.shape_cast %0 : vector<1x1x2x128xf32> to vector<2x128xf32>
    %c0_3 = arith.constant 0 : index
    %c1 = arith.constant 1 : index
    %c0_4 = arith.constant 0 : index
    %c0_5 = arith.constant 0 : index
    %2 = vector.load %arg2[%c0_3, %c1, %c0_4, %c0_5] : memref<1x3x2x128xf32, #tpu.memory_space<vmem>>, vector<1x1x2x128xf32>
    %3 = vector.shape_cast %2 : vector<1x1x2x128xf32> to vector<2x128xf32>
    %c0_6 = arith.constant 0 : index
    %c2 = arith.constant 2 : index
    %c0_7 = arith.constant 0 : index
    %c0_8 = arith.constant 0 : index
    %4 = vector.load %arg2[%c0_6, %c2, %c0_7, %c0_8] : memref<1x3x2x128xf32, #tpu.memory_space<vmem>>, vector<1x1x2x128xf32>
    %5 = vector.shape_cast %4 : vector<1x1x2x128xf32> to vector<2x128xf32>
    %c0_9 = arith.constant 0 : index
    %c0_10 = arith.constant 0 : index
    %6 = memref.load %arg3[%c0_9, %c0_10] : memref<3x4xf32, #tpu.memory_space<smem>>
    %7 = vector.broadcast %6 : f32 to vector<2x128xf32>
    %8 = arith.mulf %1, %7 : vector<2x128xf32>
    %c1_11 = arith.constant 1 : index
    %c0_12 = arith.constant 0 : index
    %9 = memref.load %arg3[%c1_11, %c0_12] : memref<3x4xf32, #tpu.memory_space<smem>>
    %10 = vector.broadcast %9 : f32 to vector<2x128xf32>
    %11 = arith.mulf %3, %10 : vector<2x128xf32>
    %12 = arith.addf %8, %11 : vector<2x128xf32>
    %c2_13 = arith.constant 2 : index
    %c0_14 = arith.constant 0 : index
    %13 = memref.load %arg3[%c2_13, %c0_14] : memref<3x4xf32, #tpu.memory_space<smem>>
    %14 = vector.broadcast %13 : f32 to vector<2x128xf32>
    %15 = arith.mulf %5, %14 : vector<2x128xf32>
    %16 = arith.addf %12, %15 : vector<2x128xf32>
    %c0_15 = arith.constant 0 : index
    %17 = memref.load %arg4[%c0_15] : memref<4xf32, #tpu.memory_space<smem>>
    %18 = vector.broadcast %17 : f32 to vector<2x128xf32>
    %19 = arith.addf %16, %18 : vector<2x128xf32>
    %cst = arith.constant 0.000000e+00 : f32
    %20 = vector.broadcast %cst : f32 to vector<2x128xf32>
    %21 = arith.maximumf %19, %20 : vector<2x128xf32>
    %c0_16 = arith.constant 0 : index
    %c1_17 = arith.constant 1 : index
    %22 = memref.load %arg3[%c0_16, %c1_17] : memref<3x4xf32, #tpu.memory_space<smem>>
    %23 = vector.broadcast %22 : f32 to vector<2x128xf32>
    %24 = arith.mulf %1, %23 : vector<2x128xf32>
    %c1_18 = arith.constant 1 : index
    %c1_19 = arith.constant 1 : index
    %25 = memref.load %arg3[%c1_18, %c1_19] : memref<3x4xf32, #tpu.memory_space<smem>>
    %26 = vector.broadcast %25 : f32 to vector<2x128xf32>
    %27 = arith.mulf %3, %26 : vector<2x128xf32>
    %28 = arith.addf %24, %27 : vector<2x128xf32>
    %c2_20 = arith.constant 2 : index
    %c1_21 = arith.constant 1 : index
    %29 = memref.load %arg3[%c2_20, %c1_21] : memref<3x4xf32, #tpu.memory_space<smem>>
    %30 = vector.broadcast %29 : f32 to vector<2x128xf32>
    %31 = arith.mulf %5, %30 : vector<2x128xf32>
    %32 = arith.addf %28, %31 : vector<2x128xf32>
    %c1_22 = arith.constant 1 : index
    %33 = memref.load %arg4[%c1_22] : memref<4xf32, #tpu.memory_space<smem>>
    %34 = vector.broadcast %33 : f32 to vector<2x128xf32>
    %35 = arith.addf %32, %34 : vector<2x128xf32>
    %cst_23 = arith.constant 0.000000e+00 : f32
    %36 = vector.broadcast %cst_23 : f32 to vector<2x128xf32>
    %37 = arith.maximumf %35, %36 : vector<2x128xf32>
    %c0_24 = arith.constant 0 : index
    %c2_25 = arith.constant 2 : index
    %38 = memref.load %arg3[%c0_24, %c2_25] : memref<3x4xf32, #tpu.memory_space<smem>>
    %39 = vector.broadcast %38 : f32 to vector<2x128xf32>
    %40 = arith.mulf %1, %39 : vector<2x128xf32>
    %c1_26 = arith.constant 1 : index
    %c2_27 = arith.constant 2 : index
    %41 = memref.load %arg3[%c1_26, %c2_27] : memref<3x4xf32, #tpu.memory_space<smem>>
    %42 = vector.broadcast %41 : f32 to vector<2x128xf32>
    %43 = arith.mulf %3, %42 : vector<2x128xf32>
    %44 = arith.addf %40, %43 : vector<2x128xf32>
    %c2_28 = arith.constant 2 : index
    %c2_29 = arith.constant 2 : index
    %45 = memref.load %arg3[%c2_28, %c2_29] : memref<3x4xf32, #tpu.memory_space<smem>>
    %46 = vector.broadcast %45 : f32 to vector<2x128xf32>
    %47 = arith.mulf %5, %46 : vector<2x128xf32>
    %48 = arith.addf %44, %47 : vector<2x128xf32>
    %c2_30 = arith.constant 2 : index
    %49 = memref.load %arg4[%c2_30] : memref<4xf32, #tpu.memory_space<smem>>
    %50 = vector.broadcast %49 : f32 to vector<2x128xf32>
    %51 = arith.addf %48, %50 : vector<2x128xf32>
    %cst_31 = arith.constant 0.000000e+00 : f32
    %52 = vector.broadcast %cst_31 : f32 to vector<2x128xf32>
    %53 = arith.maximumf %51, %52 : vector<2x128xf32>
    %c0_32 = arith.constant 0 : index
    %c3 = arith.constant 3 : index
    %54 = memref.load %arg3[%c0_32, %c3] : memref<3x4xf32, #tpu.memory_space<smem>>
    %55 = vector.broadcast %54 : f32 to vector<2x128xf32>
    %56 = arith.mulf %1, %55 : vector<2x128xf32>
    %c1_33 = arith.constant 1 : index
    %c3_34 = arith.constant 3 : index
    %57 = memref.load %arg3[%c1_33, %c3_34] : memref<3x4xf32, #tpu.memory_space<smem>>
    %58 = vector.broadcast %57 : f32 to vector<2x128xf32>
    %59 = arith.mulf %3, %58 : vector<2x128xf32>
    %60 = arith.addf %56, %59 : vector<2x128xf32>
    %c2_35 = arith.constant 2 : index
    %c3_36 = arith.constant 3 : index
    %61 = memref.load %arg3[%c2_35, %c3_36] : memref<3x4xf32, #tpu.memory_space<smem>>
    %62 = vector.broadcast %61 : f32 to vector<2x128xf32>
    %63 = arith.mulf %5, %62 : vector<2x128xf32>
    %64 = arith.addf %60, %63 : vector<2x128xf32>
    %c3_37 = arith.constant 3 : index
    %65 = memref.load %arg4[%c3_37] : memref<4xf32, #tpu.memory_space<smem>>
    %66 = vector.broadcast %65 : f32 to vector<2x128xf32>
    %67 = arith.addf %64, %66 : vector<2x128xf32>
    %cst_38 = arith.constant 0.000000e+00 : f32
    %68 = vector.broadcast %cst_38 : f32 to vector<2x128xf32>
    %69 = arith.maximumf %67, %68 : vector<2x128xf32>
    %c0_39 = arith.constant 0 : index
    %c0_40 = arith.constant 0 : index
    %70 = memref.load %arg5[%c0_39, %c0_40] : memref<4x4xf32, #tpu.memory_space<smem>>
    %71 = vector.broadcast %70 : f32 to vector<2x128xf32>
    %72 = arith.mulf %21, %71 : vector<2x128xf32>
    %c1_41 = arith.constant 1 : index
    %c0_42 = arith.constant 0 : index
    %73 = memref.load %arg5[%c1_41, %c0_42] : memref<4x4xf32, #tpu.memory_space<smem>>
    %74 = vector.broadcast %73 : f32 to vector<2x128xf32>
    %75 = arith.mulf %37, %74 : vector<2x128xf32>
    %76 = arith.addf %72, %75 : vector<2x128xf32>
    %c2_43 = arith.constant 2 : index
    %c0_44 = arith.constant 0 : index
    %77 = memref.load %arg5[%c2_43, %c0_44] : memref<4x4xf32, #tpu.memory_space<smem>>
    %78 = vector.broadcast %77 : f32 to vector<2x128xf32>
    %79 = arith.mulf %53, %78 : vector<2x128xf32>
    %80 = arith.addf %76, %79 : vector<2x128xf32>
    %c3_45 = arith.constant 3 : index
    %c0_46 = arith.constant 0 : index
    %81 = memref.load %arg5[%c3_45, %c0_46] : memref<4x4xf32, #tpu.memory_space<smem>>
    %82 = vector.broadcast %81 : f32 to vector<2x128xf32>
    %83 = arith.mulf %69, %82 : vector<2x128xf32>
    %84 = arith.addf %80, %83 : vector<2x128xf32>
    %c0_47 = arith.constant 0 : index
    %85 = memref.load %arg6[%c0_47] : memref<4xf32, #tpu.memory_space<smem>>
    %86 = vector.broadcast %85 : f32 to vector<2x128xf32>
    %87 = arith.addf %84, %86 : vector<2x128xf32>
    %cst_48 = arith.constant 0.000000e+00 : f32
    %88 = vector.broadcast %cst_48 : f32 to vector<2x128xf32>
    %89 = arith.maximumf %87, %88 : vector<2x128xf32>
    %c0_49 = arith.constant 0 : index
    %c1_50 = arith.constant 1 : index
    %90 = memref.load %arg5[%c0_49, %c1_50] : memref<4x4xf32, #tpu.memory_space<smem>>
    %91 = vector.broadcast %90 : f32 to vector<2x128xf32>
    %92 = arith.mulf %21, %91 : vector<2x128xf32>
    %c1_51 = arith.constant 1 : index
    %c1_52 = arith.constant 1 : index
    %93 = memref.load %arg5[%c1_51, %c1_52] : memref<4x4xf32, #tpu.memory_space<smem>>
    %94 = vector.broadcast %93 : f32 to vector<2x128xf32>
    %95 = arith.mulf %37, %94 : vector<2x128xf32>
    %96 = arith.addf %92, %95 : vector<2x128xf32>
    %c2_53 = arith.constant 2 : index
    %c1_54 = arith.constant 1 : index
    %97 = memref.load %arg5[%c2_53, %c1_54] : memref<4x4xf32, #tpu.memory_space<smem>>
    %98 = vector.broadcast %97 : f32 to vector<2x128xf32>
    %99 = arith.mulf %53, %98 : vector<2x128xf32>
    %100 = arith.addf %96, %99 : vector<2x128xf32>
    %c3_55 = arith.constant 3 : index
    %c1_56 = arith.constant 1 : index
    %101 = memref.load %arg5[%c3_55, %c1_56] : memref<4x4xf32, #tpu.memory_space<smem>>
    %102 = vector.broadcast %101 : f32 to vector<2x128xf32>
    %103 = arith.mulf %69, %102 : vector<2x128xf32>
    %104 = arith.addf %100, %103 : vector<2x128xf32>
    %c1_57 = arith.constant 1 : index
    %105 = memref.load %arg6[%c1_57] : memref<4xf32, #tpu.memory_space<smem>>
    %106 = vector.broadcast %105 : f32 to vector<2x128xf32>
    %107 = arith.addf %104, %106 : vector<2x128xf32>
    %cst_58 = arith.constant 0.000000e+00 : f32
    %108 = vector.broadcast %cst_58 : f32 to vector<2x128xf32>
    %109 = arith.maximumf %107, %108 : vector<2x128xf32>
    %c0_59 = arith.constant 0 : index
    %c2_60 = arith.constant 2 : index
    %110 = memref.load %arg5[%c0_59, %c2_60] : memref<4x4xf32, #tpu.memory_space<smem>>
    %111 = vector.broadcast %110 : f32 to vector<2x128xf32>
    %112 = arith.mulf %21, %111 : vector<2x128xf32>
    %c1_61 = arith.constant 1 : index
    %c2_62 = arith.constant 2 : index
    %113 = memref.load %arg5[%c1_61, %c2_62] : memref<4x4xf32, #tpu.memory_space<smem>>
    %114 = vector.broadcast %113 : f32 to vector<2x128xf32>
    %115 = arith.mulf %37, %114 : vector<2x128xf32>
    %116 = arith.addf %112, %115 : vector<2x128xf32>
    %c2_63 = arith.constant 2 : index
    %c2_64 = arith.constant 2 : index
    %117 = memref.load %arg5[%c2_63, %c2_64] : memref<4x4xf32, #tpu.memory_space<smem>>
    %118 = vector.broadcast %117 : f32 to vector<2x128xf32>
    %119 = arith.mulf %53, %118 : vector<2x128xf32>
    %120 = arith.addf %116, %119 : vector<2x128xf32>
    %c3_65 = arith.constant 3 : index
    %c2_66 = arith.constant 2 : index
    %121 = memref.load %arg5[%c3_65, %c2_66] : memref<4x4xf32, #tpu.memory_space<smem>>
    %122 = vector.broadcast %121 : f32 to vector<2x128xf32>
    %123 = arith.mulf %69, %122 : vector<2x128xf32>
    %124 = arith.addf %120, %123 : vector<2x128xf32>
    %c2_67 = arith.constant 2 : index
    %125 = memref.load %arg6[%c2_67] : memref<4xf32, #tpu.memory_space<smem>>
    %126 = vector.broadcast %125 : f32 to vector<2x128xf32>
    %127 = arith.addf %124, %126 : vector<2x128xf32>
    %cst_68 = arith.constant 0.000000e+00 : f32
    %128 = vector.broadcast %cst_68 : f32 to vector<2x128xf32>
    %129 = arith.maximumf %127, %128 : vector<2x128xf32>
    %c0_69 = arith.constant 0 : index
    %c3_70 = arith.constant 3 : index
    %130 = memref.load %arg5[%c0_69, %c3_70] : memref<4x4xf32, #tpu.memory_space<smem>>
    %131 = vector.broadcast %130 : f32 to vector<2x128xf32>
    %132 = arith.mulf %21, %131 : vector<2x128xf32>
    %c1_71 = arith.constant 1 : index
    %c3_72 = arith.constant 3 : index
    %133 = memref.load %arg5[%c1_71, %c3_72] : memref<4x4xf32, #tpu.memory_space<smem>>
    %134 = vector.broadcast %133 : f32 to vector<2x128xf32>
    %135 = arith.mulf %37, %134 : vector<2x128xf32>
    %136 = arith.addf %132, %135 : vector<2x128xf32>
    %c2_73 = arith.constant 2 : index
    %c3_74 = arith.constant 3 : index
    %137 = memref.load %arg5[%c2_73, %c3_74] : memref<4x4xf32, #tpu.memory_space<smem>>
    %138 = vector.broadcast %137 : f32 to vector<2x128xf32>
    %139 = arith.mulf %53, %138 : vector<2x128xf32>
    %140 = arith.addf %136, %139 : vector<2x128xf32>
    %c3_75 = arith.constant 3 : index
    %c3_76 = arith.constant 3 : index
    %141 = memref.load %arg5[%c3_75, %c3_76] : memref<4x4xf32, #tpu.memory_space<smem>>
    %142 = vector.broadcast %141 : f32 to vector<2x128xf32>
    %143 = arith.mulf %69, %142 : vector<2x128xf32>
    %144 = arith.addf %140, %143 : vector<2x128xf32>
    %c3_77 = arith.constant 3 : index
    %145 = memref.load %arg6[%c3_77] : memref<4xf32, #tpu.memory_space<smem>>
    %146 = vector.broadcast %145 : f32 to vector<2x128xf32>
    %147 = arith.addf %144, %146 : vector<2x128xf32>
    %cst_78 = arith.constant 0.000000e+00 : f32
    %148 = vector.broadcast %cst_78 : f32 to vector<2x128xf32>
    %149 = arith.maximumf %147, %148 : vector<2x128xf32>
    %c0_79 = arith.constant 0 : index
    %c0_80 = arith.constant 0 : index
    %150 = memref.load %arg7[%c0_79, %c0_80] : memref<4x4xf32, #tpu.memory_space<smem>>
    %151 = vector.broadcast %150 : f32 to vector<2x128xf32>
    %152 = arith.mulf %89, %151 : vector<2x128xf32>
    %c1_81 = arith.constant 1 : index
    %c0_82 = arith.constant 0 : index
    %153 = memref.load %arg7[%c1_81, %c0_82] : memref<4x4xf32, #tpu.memory_space<smem>>
    %154 = vector.broadcast %153 : f32 to vector<2x128xf32>
    %155 = arith.mulf %109, %154 : vector<2x128xf32>
    %156 = arith.addf %152, %155 : vector<2x128xf32>
    %c2_83 = arith.constant 2 : index
    %c0_84 = arith.constant 0 : index
    %157 = memref.load %arg7[%c2_83, %c0_84] : memref<4x4xf32, #tpu.memory_space<smem>>
    %158 = vector.broadcast %157 : f32 to vector<2x128xf32>
    %159 = arith.mulf %129, %158 : vector<2x128xf32>
    %160 = arith.addf %156, %159 : vector<2x128xf32>
    %c3_85 = arith.constant 3 : index
    %c0_86 = arith.constant 0 : index
    %161 = memref.load %arg7[%c3_85, %c0_86] : memref<4x4xf32, #tpu.memory_space<smem>>
    %162 = vector.broadcast %161 : f32 to vector<2x128xf32>
    %163 = arith.mulf %149, %162 : vector<2x128xf32>
    %164 = arith.addf %160, %163 : vector<2x128xf32>
    %c0_87 = arith.constant 0 : index
    %165 = memref.load %arg8[%c0_87] : memref<4xf32, #tpu.memory_space<smem>>
    %166 = vector.broadcast %165 : f32 to vector<2x128xf32>
    %167 = arith.addf %164, %166 : vector<2x128xf32>
    %cst_88 = arith.constant 0.000000e+00 : f32
    %168 = vector.broadcast %cst_88 : f32 to vector<2x128xf32>
    %169 = arith.maximumf %167, %168 : vector<2x128xf32>
    %c0_89 = arith.constant 0 : index
    %c1_90 = arith.constant 1 : index
    %170 = memref.load %arg7[%c0_89, %c1_90] : memref<4x4xf32, #tpu.memory_space<smem>>
    %171 = vector.broadcast %170 : f32 to vector<2x128xf32>
    %172 = arith.mulf %89, %171 : vector<2x128xf32>
    %c1_91 = arith.constant 1 : index
    %c1_92 = arith.constant 1 : index
    %173 = memref.load %arg7[%c1_91, %c1_92] : memref<4x4xf32, #tpu.memory_space<smem>>
    %174 = vector.broadcast %173 : f32 to vector<2x128xf32>
    %175 = arith.mulf %109, %174 : vector<2x128xf32>
    %176 = arith.addf %172, %175 : vector<2x128xf32>
    %c2_93 = arith.constant 2 : index
    %c1_94 = arith.constant 1 : index
    %177 = memref.load %arg7[%c2_93, %c1_94] : memref<4x4xf32, #tpu.memory_space<smem>>
    %178 = vector.broadcast %177 : f32 to vector<2x128xf32>
    %179 = arith.mulf %129, %178 : vector<2x128xf32>
    %180 = arith.addf %176, %179 : vector<2x128xf32>
    %c3_95 = arith.constant 3 : index
    %c1_96 = arith.constant 1 : index
    %181 = memref.load %arg7[%c3_95, %c1_96] : memref<4x4xf32, #tpu.memory_space<smem>>
    %182 = vector.broadcast %181 : f32 to vector<2x128xf32>
    %183 = arith.mulf %149, %182 : vector<2x128xf32>
    %184 = arith.addf %180, %183 : vector<2x128xf32>
    %c1_97 = arith.constant 1 : index
    %185 = memref.load %arg8[%c1_97] : memref<4xf32, #tpu.memory_space<smem>>
    %186 = vector.broadcast %185 : f32 to vector<2x128xf32>
    %187 = arith.addf %184, %186 : vector<2x128xf32>
    %cst_98 = arith.constant 0.000000e+00 : f32
    %188 = vector.broadcast %cst_98 : f32 to vector<2x128xf32>
    %189 = arith.maximumf %187, %188 : vector<2x128xf32>
    %c0_99 = arith.constant 0 : index
    %c2_100 = arith.constant 2 : index
    %190 = memref.load %arg7[%c0_99, %c2_100] : memref<4x4xf32, #tpu.memory_space<smem>>
    %191 = vector.broadcast %190 : f32 to vector<2x128xf32>
    %192 = arith.mulf %89, %191 : vector<2x128xf32>
    %c1_101 = arith.constant 1 : index
    %c2_102 = arith.constant 2 : index
    %193 = memref.load %arg7[%c1_101, %c2_102] : memref<4x4xf32, #tpu.memory_space<smem>>
    %194 = vector.broadcast %193 : f32 to vector<2x128xf32>
    %195 = arith.mulf %109, %194 : vector<2x128xf32>
    %196 = arith.addf %192, %195 : vector<2x128xf32>
    %c2_103 = arith.constant 2 : index
    %c2_104 = arith.constant 2 : index
    %197 = memref.load %arg7[%c2_103, %c2_104] : memref<4x4xf32, #tpu.memory_space<smem>>
    %198 = vector.broadcast %197 : f32 to vector<2x128xf32>
    %199 = arith.mulf %129, %198 : vector<2x128xf32>
    %200 = arith.addf %196, %199 : vector<2x128xf32>
    %c3_105 = arith.constant 3 : index
    %c2_106 = arith.constant 2 : index
    %201 = memref.load %arg7[%c3_105, %c2_106] : memref<4x4xf32, #tpu.memory_space<smem>>
    %202 = vector.broadcast %201 : f32 to vector<2x128xf32>
    %203 = arith.mulf %149, %202 : vector<2x128xf32>
    %204 = arith.addf %200, %203 : vector<2x128xf32>
    %c2_107 = arith.constant 2 : index
    %205 = memref.load %arg8[%c2_107] : memref<4xf32, #tpu.memory_space<smem>>
    %206 = vector.broadcast %205 : f32 to vector<2x128xf32>
    %207 = arith.addf %204, %206 : vector<2x128xf32>
    %cst_108 = arith.constant 0.000000e+00 : f32
    %208 = vector.broadcast %cst_108 : f32 to vector<2x128xf32>
    %209 = arith.maximumf %207, %208 : vector<2x128xf32>
    %c0_109 = arith.constant 0 : index
    %c3_110 = arith.constant 3 : index
    %210 = memref.load %arg7[%c0_109, %c3_110] : memref<4x4xf32, #tpu.memory_space<smem>>
    %211 = vector.broadcast %210 : f32 to vector<2x128xf32>
    %212 = arith.mulf %89, %211 : vector<2x128xf32>
    %c1_111 = arith.constant 1 : index
    %c3_112 = arith.constant 3 : index
    %213 = memref.load %arg7[%c1_111, %c3_112] : memref<4x4xf32, #tpu.memory_space<smem>>
    %214 = vector.broadcast %213 : f32 to vector<2x128xf32>
    %215 = arith.mulf %109, %214 : vector<2x128xf32>
    %216 = arith.addf %212, %215 : vector<2x128xf32>
    %c2_113 = arith.constant 2 : index
    %c3_114 = arith.constant 3 : index
    %217 = memref.load %arg7[%c2_113, %c3_114] : memref<4x4xf32, #tpu.memory_space<smem>>
    %218 = vector.broadcast %217 : f32 to vector<2x128xf32>
    %219 = arith.mulf %129, %218 : vector<2x128xf32>
    %220 = arith.addf %216, %219 : vector<2x128xf32>
    %c3_115 = arith.constant 3 : index
    %c3_116 = arith.constant 3 : index
    %221 = memref.load %arg7[%c3_115, %c3_116] : memref<4x4xf32, #tpu.memory_space<smem>>
    %222 = vector.broadcast %221 : f32 to vector<2x128xf32>
    %223 = arith.mulf %149, %222 : vector<2x128xf32>
    %224 = arith.addf %220, %223 : vector<2x128xf32>
    %c3_117 = arith.constant 3 : index
    %225 = memref.load %arg8[%c3_117] : memref<4xf32, #tpu.memory_space<smem>>
    %226 = vector.broadcast %225 : f32 to vector<2x128xf32>
    %227 = arith.addf %224, %226 : vector<2x128xf32>
    %cst_118 = arith.constant 0.000000e+00 : f32
    %228 = vector.broadcast %cst_118 : f32 to vector<2x128xf32>
    %229 = arith.maximumf %227, %228 : vector<2x128xf32>
    %c0_119 = arith.constant 0 : index
    %c0_120 = arith.constant 0 : index
    %230 = memref.load %arg9[%c0_119, %c0_120] : memref<4x3xf32, #tpu.memory_space<smem>>
    %231 = vector.broadcast %230 : f32 to vector<2x128xf32>
    %232 = arith.mulf %169, %231 : vector<2x128xf32>
    %c1_121 = arith.constant 1 : index
    %c0_122 = arith.constant 0 : index
    %233 = memref.load %arg9[%c1_121, %c0_122] : memref<4x3xf32, #tpu.memory_space<smem>>
    %234 = vector.broadcast %233 : f32 to vector<2x128xf32>
    %235 = arith.mulf %189, %234 : vector<2x128xf32>
    %236 = arith.addf %232, %235 : vector<2x128xf32>
    %c2_123 = arith.constant 2 : index
    %c0_124 = arith.constant 0 : index
    %237 = memref.load %arg9[%c2_123, %c0_124] : memref<4x3xf32, #tpu.memory_space<smem>>
    %238 = vector.broadcast %237 : f32 to vector<2x128xf32>
    %239 = arith.mulf %209, %238 : vector<2x128xf32>
    %240 = arith.addf %236, %239 : vector<2x128xf32>
    %c3_125 = arith.constant 3 : index
    %c0_126 = arith.constant 0 : index
    %241 = memref.load %arg9[%c3_125, %c0_126] : memref<4x3xf32, #tpu.memory_space<smem>>
    %242 = vector.broadcast %241 : f32 to vector<2x128xf32>
    %243 = arith.mulf %229, %242 : vector<2x128xf32>
    %244 = arith.addf %240, %243 : vector<2x128xf32>
    %c0_127 = arith.constant 0 : index
    %245 = memref.load %arg10[%c0_127] : memref<3xf32, #tpu.memory_space<smem>>
    %246 = vector.broadcast %245 : f32 to vector<2x128xf32>
    %247 = arith.addf %244, %246 : vector<2x128xf32>
    %c0_128 = arith.constant 0 : index
    %c1_129 = arith.constant 1 : index
    %248 = memref.load %arg9[%c0_128, %c1_129] : memref<4x3xf32, #tpu.memory_space<smem>>
    %249 = vector.broadcast %248 : f32 to vector<2x128xf32>
    %250 = arith.mulf %169, %249 : vector<2x128xf32>
    %c1_130 = arith.constant 1 : index
    %c1_131 = arith.constant 1 : index
    %251 = memref.load %arg9[%c1_130, %c1_131] : memref<4x3xf32, #tpu.memory_space<smem>>
    %252 = vector.broadcast %251 : f32 to vector<2x128xf32>
    %253 = arith.mulf %189, %252 : vector<2x128xf32>
    %254 = arith.addf %250, %253 : vector<2x128xf32>
    %c2_132 = arith.constant 2 : index
    %c1_133 = arith.constant 1 : index
    %255 = memref.load %arg9[%c2_132, %c1_133] : memref<4x3xf32, #tpu.memory_space<smem>>
    %256 = vector.broadcast %255 : f32 to vector<2x128xf32>
    %257 = arith.mulf %209, %256 : vector<2x128xf32>
    %258 = arith.addf %254, %257 : vector<2x128xf32>
    %c3_134 = arith.constant 3 : index
    %c1_135 = arith.constant 1 : index
    %259 = memref.load %arg9[%c3_134, %c1_135] : memref<4x3xf32, #tpu.memory_space<smem>>
    %260 = vector.broadcast %259 : f32 to vector<2x128xf32>
    %261 = arith.mulf %229, %260 : vector<2x128xf32>
    %262 = arith.addf %258, %261 : vector<2x128xf32>
    %c1_136 = arith.constant 1 : index
    %263 = memref.load %arg10[%c1_136] : memref<3xf32, #tpu.memory_space<smem>>
    %264 = vector.broadcast %263 : f32 to vector<2x128xf32>
    %265 = arith.addf %262, %264 : vector<2x128xf32>
    %c0_137 = arith.constant 0 : index
    %c2_138 = arith.constant 2 : index
    %266 = memref.load %arg9[%c0_137, %c2_138] : memref<4x3xf32, #tpu.memory_space<smem>>
    %267 = vector.broadcast %266 : f32 to vector<2x128xf32>
    %268 = arith.mulf %169, %267 : vector<2x128xf32>
    %c1_139 = arith.constant 1 : index
    %c2_140 = arith.constant 2 : index
    %269 = memref.load %arg9[%c1_139, %c2_140] : memref<4x3xf32, #tpu.memory_space<smem>>
    %270 = vector.broadcast %269 : f32 to vector<2x128xf32>
    %271 = arith.mulf %189, %270 : vector<2x128xf32>
    %272 = arith.addf %268, %271 : vector<2x128xf32>
    %c2_141 = arith.constant 2 : index
    %c2_142 = arith.constant 2 : index
    %273 = memref.load %arg9[%c2_141, %c2_142] : memref<4x3xf32, #tpu.memory_space<smem>>
    %274 = vector.broadcast %273 : f32 to vector<2x128xf32>
    %275 = arith.mulf %209, %274 : vector<2x128xf32>
    %276 = arith.addf %272, %275 : vector<2x128xf32>
    %c3_143 = arith.constant 3 : index
    %c2_144 = arith.constant 2 : index
    %277 = memref.load %arg9[%c3_143, %c2_144] : memref<4x3xf32, #tpu.memory_space<smem>>
    %278 = vector.broadcast %277 : f32 to vector<2x128xf32>
    %279 = arith.mulf %229, %278 : vector<2x128xf32>
    %280 = arith.addf %276, %279 : vector<2x128xf32>
    %c2_145 = arith.constant 2 : index
    %281 = memref.load %arg10[%c2_145] : memref<3xf32, #tpu.memory_space<smem>>
    %282 = vector.broadcast %281 : f32 to vector<2x128xf32>
    %283 = arith.addf %280, %282 : vector<2x128xf32>
    %284 = arith.addf %247, %1 : vector<2x128xf32>
    %c0_146 = arith.constant 0 : index
    %c0_147 = arith.constant 0 : index
    %c0_148 = arith.constant 0 : index
    %c0_149 = arith.constant 0 : index
    %285 = vector.load %arg11[%c0_146, %c0_147, %c0_148, %c0_149] : memref<1x3x2x128xf32, #tpu.memory_space<vmem>>, vector<1x1x2x128xf32>
    %286 = vector.shape_cast %285 : vector<1x1x2x128xf32> to vector<2x128xf32>
    %287 = vector.shape_cast %284 : vector<2x128xf32> to vector<1x1x2x128xf32>
    tpu.vector_store %arg11[%c0_146, %c0_147, %c0_148, %c0_149], %287 {strides = array<i32>} : memref<1x3x2x128xf32, #tpu.memory_space<vmem>>, vector<1x1x2x128xf32>,
    %288 = arith.addf %265, %3 : vector<2x128xf32>
    %c0_150 = arith.constant 0 : index
    %c1_151 = arith.constant 1 : index
    %c0_152 = arith.constant 0 : index
    %c0_153 = arith.constant 0 : index
    %289 = vector.load %arg11[%c0_150, %c1_151, %c0_152, %c0_153] : memref<1x3x2x128xf32, #tpu.memory_space<vmem>>, vector<1x1x2x128xf32>
    %290 = vector.shape_cast %289 : vector<1x1x2x128xf32> to vector<2x128xf32>
    %291 = vector.shape_cast %288 : vector<2x128xf32> to vector<1x1x2x128xf32>
    tpu.vector_store %arg11[%c0_150, %c1_151, %c0_152, %c0_153], %291 {strides = array<i32>} : memref<1x3x2x128xf32, #tpu.memory_space<vmem>>, vector<1x1x2x128xf32>,
    %292 = arith.addf %283, %5 : vector<2x128xf32>
    %c0_154 = arith.constant 0 : index
    %c2_155 = arith.constant 2 : index
    %c0_156 = arith.constant 0 : index
    %c0_157 = arith.constant 0 : index
    %293 = vector.load %arg11[%c0_154, %c2_155, %c0_156, %c0_157] : memref<1x3x2x128xf32, #tpu.memory_space<vmem>>, vector<1x1x2x128xf32>
    %294 = vector.shape_cast %293 : vector<1x1x2x128xf32> to vector<2x128xf32>
    %295 = vector.shape_cast %292 : vector<2x128xf32> to vector<1x1x2x128xf32>
    tpu.vector_store %arg11[%c0_154, %c2_155, %c0_156, %c0_157], %295 {strides = array<i32>} : memref<1x3x2x128xf32, #tpu.memory_space<vmem>>, vector<1x1x2x128xf32>,
    return
  }
  func.func @transform_0(%arg0: i32, %arg1: i32) -> (i32, i32, i32, i32) {
    %c0_i32 = arith.constant 0 : i32
    %c0_i32_0 = arith.constant 0 : i32
    %c0_i32_1 = arith.constant 0 : i32
    return %arg0, %c0_i32, %arg1, %c0_i32_0 : i32, i32, i32, i32
  }
  func.func @transform_1(%arg0: i32, %arg1: i32) -> (i32, i32) {
    %c0_i32 = arith.constant 0 : i32
    %c0_i32_0 = arith.constant 0 : i32
    %c0_i32_1 = arith.constant 0 : i32
    return %c0_i32, %c0_i32_0 : i32, i32
  }
  func.func @transform_2(%arg0: i32, %arg1: i32) -> i32 {
    %c0_i32 = arith.constant 0 : i32
    %c0_i32_0 = arith.constant 0 : i32
    return %c0_i32 : i32
  }
  func.func @transform_3(%arg0: i32, %arg1: i32) -> (i32, i32) {
    %c0_i32 = arith.constant 0 : i32
    %c0_i32_0 = arith.constant 0 : i32
    %c0_i32_1 = arith.constant 0 : i32
    return %c0_i32, %c0_i32_0 : i32, i32
  }
  func.func @transform_4(%arg0: i32, %arg1: i32) -> i32 {
    %c0_i32 = arith.constant 0 : i32
    %c0_i32_0 = arith.constant 0 : i32
    return %c0_i32 : i32
  }
  func.func @transform_5(%arg0: i32, %arg1: i32) -> (i32, i32) {
    %c0_i32 = arith.constant 0 : i32
    %c0_i32_0 = arith.constant 0 : i32
    %c0_i32_1 = arith.constant 0 : i32
    return %c0_i32, %c0_i32_0 : i32, i32
  }
  func.func @transform_6(%arg0: i32, %arg1: i32) -> i32 {
    %c0_i32 = arith.constant 0 : i32
    %c0_i32_0 = arith.constant 0 : i32
    return %c0_i32 : i32
  }
  func.func @transform_7(%arg0: i32, %arg1: i32) -> (i32, i32) {
    %c0_i32 = arith.constant 0 : i32
    %c0_i32_0 = arith.constant 0 : i32
    %c0_i32_1 = arith.constant 0 : i32
    return %c0_i32, %c0_i32_0 : i32, i32
  }
  func.func @transform_8(%arg0: i32, %arg1: i32) -> i32 {
    %c0_i32 = arith.constant 0 : i32
    %c0_i32_0 = arith.constant 0 : i32
    return %c0_i32 : i32
  }
  func.func @transform_9(%arg0: i32, %arg1: i32) -> (i32, i32, i32, i32) {
    %c0_i32 = arith.constant 0 : i32
    %c0_i32_0 = arith.constant 0 : i32
    %c0_i32_1 = arith.constant 0 : i32
    return %arg0, %c0_i32, %arg1, %c0_i32_0 : i32, i32, i32, i32
  }
}

</mosaic_0001>

<bundles_post_ra>
// kernel: pronet_forward.1
= control target key start
LH: loop header
LB: loop body
LE: loop exit
PB: predicated region body
PF: predicated region fallthrough
CT: control target
= control target key end

     0   :  { %s1702_s0 = inlined_call_operand.vmem [shape: f32[2,3,2,128], index: 0, kind: input, shape index: {}]   ;;  %s1703_s1 = inlined_call_operand.vmem [shape: f32[3,4], index: 1, kind: input, shape index: {}]   ;;  %s1704_s2 = inlined_call_operand.vmem [shape: f32[4], index: 2, kind: input, shape index: {}]   ;;  %s1705_s3 = inlined_call_operand.vmem [shape: f32[4,4], index: 3, kind: input, shape index: {}]   ;;  %s1706_s4 = inlined_call_operand.vmem [shape: f32[4], index: 4, kind: input, shape index: {}]   ;;  %s1707_s5 = inlined_call_operand.vmem [shape: f32[4,4], index: 5, kind: input, shape index: {}]   ;;  %s1708_s6 = inlined_call_operand.vmem [shape: f32[4], index: 6, kind: input, shape index: {}]   ;;  %s1709_s7 = inlined_call_operand.vmem [shape: f32[4,3], index: 7, kind: input, shape index: {}]   ;;  %s1710_s8 = inlined_call_operand.vmem [shape: f32[3], index: 8, kind: input, shape index: {}]   ;;  %s1711_s9 = inlined_call_operand.vmem [shape: f32[2,3,2,128], index: 9, kind: output, shape index: {}]  }
   0x1   :  { %1716 = sst [smem:[#allocation20_spill]] %s1702_s0 }
   0x2   :  { %14 = vsyncpa [#allocation3], 0 }
   0x3   :  { %15 = vsyncpa [#allocation5], 0 }
   0x4   :  { %16 = vsyncpa [#allocation8], 0 }
   0x5   :  { %17 = vsyncpa [#allocation11], 0 }
   0x6   :  { %18 = vsyncpa [#allocation14], 0  ;;  %s1328_s30 = smov 0   ;;  %s1330_s10 = smov 0  }
   0x7   :  { %s1332_s11 = smov 0  }
   0x8 LB: > { %s289_s14 = sshll.u32 %s1704_s2, 4  ;;  %s908_s15 = sadd.s32 4294967295, %s1268_s11   ;;  %s1268_s11 = sphi %s1332_s11, %s24_s11   ;;  %s1264_s10 = sphi %s1330_s10, %s1726_s10   ;;  %s1260_s30 = sphi %s1328_s30, %s1725_s30   ;;  %s290_s14 = int_to_ptr.vmem [resolvable:$true] %s289_s14 }
   0x9   : > { %p910_p0 = scmp.ge.s32.totalorder %s1268_s11, 1  ;;  %p265_p1 = scmp.lt.s32.totalorder %s1268_s11, 3 }
   0xa   : > { %p1349_p2 = scmp.eq.s32.totalorder %s908_s15, 0  ;;  %s311_s20 = sshll.u32 %s1706_s4, 4  ;;  %s312_s20 = int_to_ptr.vmem [resolvable:$true] %s311_s20 }
   0xb   : > { %p1353_p3 = pnand %p910_p0, %p265_p1  ;;  %s333_s23 = sshll.u32 %s1708_s6, 4  ;;  %s1365_s23 = int_to_ptr.vmem [resolvable:$true] %s333_s23 }
   0xc   : > { %s1717_s16 = scalar_select %p1349_p2, 1, 0 }
   0xd   : > { %s1718_s17 = scalar_select %p1353_p3, 1, 0 }
   0xe   : > { %p1033_p4 = pneg %p1353_p3  ;;  %s1106_s25 = scalar_lea.vmem %s290_s14, 16 }
   0xf   : > { %p1107_p6 = scmp.ne.s32.totalorder %s290_s14, %s1106_s25  ;;  %p1114_p10 = scmp.lt.s32.totalorder %s290_s14, %s290_s14 }
  0x10   : > { %p1369_p5 = pnand %p1349_p2, %p1033_p4  ;;  %p1115_p11 = scmp.lt.s32.totalorder %s1106_s25, %s1106_s25 }
  0x12   : > { %p1375_p7 = pneg %p1369_p5  ;;  %p1116_p12 = por %p1115_p11, %p1114_p10 }
  0x14   : > { %p1109_p8 = pnand %p1375_p7, %p1107_p6 }
  0x16   : > { %p1110_p9 = pneg %p1109_p8 }
  0x18   : > { %p1117_p13 = pnand %p1116_p12, %p1110_p9 }
  0x1a   : > { %1120 = shalt.err (!%p1117_p13)
}
  0x1b   : > { %s1270_s27 = smov [#allocation4]   ;;  %s1121_s28 = scalar_lea.vmem %s312_s20, 16 }
  0x1c   : > { %1039 = dma.vmem_to_smem (!%p1369_p5), %s290_s14, 16, %s1270_s27, [#allocation5]  }
  0x1d   : > { %p1122_p0 = scmp.ne.s32.totalorder %s312_s20, %s1121_s28  ;;  %p1129_p2 = scmp.lt.s32.totalorder %s312_s20, %s312_s20 }
  0x1e   : > { %p1130_p3 = scmp.lt.s32.totalorder %s1121_s28, %s1121_s28 }
  0x1f   : > { %p1124_p1 = pnand %p1122_p0, %p1375_p7 }
  0x20   : > { %p1131_p6 = por %p1130_p3, %p1129_p2 }
  0x21   : > { %p1125_p4 = pneg %p1124_p1 }
  0x23   : > { %p1132_p8 = pnand %p1131_p6, %p1125_p4 }
  0x25   : > { %1135 = shalt.err (!%p1132_p8)
}
  0x26   : > { %s1271_s29 = smov [#allocation7]   ;;  %s1136_s12 = scalar_lea.vmem %s1365_s23, 16 }
  0x27   : > { %1045 = dma.vmem_to_smem (!%p1369_p5), %s312_s20, 16, %s1271_s29, [#allocation8]  }
  0x28   : > { %p1137_p9 = scmp.ne.s32.totalorder %s1365_s23, %s1136_s12  ;;  %p1144_p12 = scmp.lt.s32.totalorder %s1365_s23, %s1365_s23 }
  0x29   : > { %p1145_p13 = scmp.lt.s32.totalorder %s1136_s12, %s1136_s12 }
  0x2a   : > { %p1139_p10 = pnand %p1137_p9, %p1375_p7 }
  0x2b   : > { %p1146_p0 = por %p1145_p13, %p1144_p12 }
  0x2c   : > { %p1140_p11 = pneg %p1139_p10 }
  0x2e   : > { %p1147_p2 = pnand %p1146_p0, %p1140_p11 }
  0x30   : > { %1150 = shalt.err (!%p1147_p2)
}
  0x31   : > { %s1272_s13 = smov [#allocation10]   ;;  %s36_s14 = sadd.s32 1, %s1264_s10 }
  0x32   : > { %1051 = dma.vmem_to_smem (!%p1369_p5), %s1365_s23, 16, %s1272_s13, [#allocation11]  }
  0x33   : > { %s278_s19 = sshll.u32 %s1703_s1, 4  ;;  %p38_p3 = scmp.ge.s32.totalorder %s36_s14, 2  ;;  %s279_s19 = int_to_ptr.vmem [resolvable:$true] %s278_s19 }
  0x34   : > { %s300_s22 = sshll.u32 %s1705_s3, 4  ;;  %s1151_s25 = scalar_lea.vmem %s279_s19, 64  ;;  %s301_s22 = int_to_ptr.vmem [resolvable:$true] %s300_s22 }
  0x35   : > { %s1728_s14 = smov (%p38_p3, %s36_s14), 0  ;;  %p1152_p1 = scmp.ne.s32.totalorder %s279_s19, %s1151_s25 }
  0x36   : > { %p1159_p8 = scmp.lt.s32.totalorder %s279_s19, %s279_s19  ;;  %p1160_p9 = scmp.lt.s32.totalorder %s1151_s25, %s1151_s25 }
  0x37   : > { %p1154_p4 = pnand %p1152_p1, %p1375_p7 }
  0x38   : > { %p1161_p10 = por %p1160_p9, %p1159_p8 }
  0x39   : > { %p1155_p6 = pneg %p1154_p4 }
  0x3b   : > { %p1162_p11 = pnand %p1161_p10, %p1155_p6 }
  0x3d   : > { %1165 = shalt.err (!%p1162_p11)
}
  0x3e   : > { %s1273_s23 = smov [#allocation2]   ;;  %s1166_s27 = scalar_lea.vmem %s301_s22, 64 }
  0x3f   : > { %1036 = dma.vmem_to_smem (!%p1369_p5), %s279_s19, 64, %s1273_s23, [#allocation3]  }
  0x40   : > { %p1167_p12 = scmp.ne.s32.totalorder %s301_s22, %s1166_s27  ;;  %p1174_p2 = scmp.lt.s32.totalorder %s301_s22, %s301_s22 }
  0x41   : > { %p1175_p3 = scmp.lt.s32.totalorder %s1166_s27, %s1166_s27 }
  0x42   : > { %p1169_p13 = pnand %p1167_p12, %p1375_p7 }
  0x43   : > { %p1176_p1 = por %p1175_p3, %p1174_p2 }
  0x44   : > { %p1170_p0 = pneg %p1169_p13 }
  0x46   : > { %p1177_p4 = pnand %p1176_p1, %p1170_p0 }
  0x48   : > { %1180 = shalt.err (!%p1177_p4)
}
  0x49   : > { %s1274_s28 = smov [#allocation6]   ;;  %s322_s13 = sshll.u32 %s1707_s5, 4  ;;  %s323_s13 = int_to_ptr.vmem [resolvable:$true] %s322_s13 }
  0x4a   : > { %1042 = dma.vmem_to_smem (!%p1369_p5), %s301_s22, 64, %s1274_s28, [#allocation5]  }
  0x4b   : > { %s344_s19 = sshll.u32 %s1709_s7, 4  ;;  %s1181_s20 = scalar_lea.vmem %s323_s13, 64  ;;  %s345_s19 = int_to_ptr.vmem [resolvable:$true] %s344_s19 }
  0x4c   : > { %p1182_p6 = scmp.ne.s32.totalorder %s323_s13, %s1181_s20  ;;  %p1189_p10 = scmp.lt.s32.totalorder %s323_s13, %s323_s13 }
  0x4d   : > { %p1190_p11 = scmp.lt.s32.totalorder %s1181_s20, %s1181_s20 }
  0x4e   : > { %p1184_p8 = pnand %p1182_p6, %p1375_p7 }
  0x4f   : > { %p1191_p12 = por %p1190_p11, %p1189_p10 }
  0x50   : > { %p1185_p9 = pneg %p1184_p8 }
  0x52   : > { %p1192_p13 = pnand %p1191_p12, %p1185_p9 }
  0x54   : > { %1195 = shalt.err (!%p1192_p13)
}
  0x55   : > { %s1275_s21 = smov [#allocation9]   ;;  %s1196_s22 = scalar_lea.vmem %s345_s19, 64 }
  0x56   : > { %1048 = dma.vmem_to_smem (!%p1369_p5), %s323_s13, 64, %s1275_s21, [#allocation8]  }
  0x57   : > { %p1197_p0 = scmp.ne.s32.totalorder %s345_s19, %s1196_s22  ;;  %p1204_p1 = scmp.lt.s32.totalorder %s345_s19, %s345_s19 }
  0x58   : > { %p1205_p4 = scmp.lt.s32.totalorder %s1196_s22, %s1196_s22 }
  0x59   : > { %p1199_p2 = pnand %p1197_p0, %p1375_p7 }
  0x5a   : > { %p1206_p6 = por %p1205_p4, %p1204_p1 }
  0x5b   : > { %p1200_p3 = pneg %p1199_p2 }
  0x5d   : > { %p1207_p8 = pnand %p1206_p6, %p1200_p3 }
  0x5f   : > { %1210 = shalt.err (!%p1207_p8)
}
  0x60   : > { %s1276_s25 = smov [#allocation12]   ;;  %s355_s28 = sshll.u32 %s1710_s8, 4  ;;  %s356_s28 = int_to_ptr.vmem [resolvable:$true] %s355_s28 }
  0x61   : > { %1054 = dma.vmem_to_smem (!%p1369_p5), %s345_s19, 64, %s1276_s25, [#allocation11]  }
  0x62   : > { %s1211_s29 = scalar_lea.vmem %s356_s28, 16  ;;  %p1219_p12 = scmp.lt.s32.totalorder %s356_s28, %s356_s28 }
  0x63   : > { %p1212_p9 = scmp.ne.s32.totalorder %s356_s28, %s1211_s29  ;;  %p1220_p13 = scmp.lt.s32.totalorder %s1211_s29, %s1211_s29 }
  0x65   : > { %p1214_p10 = pnand %p1212_p9, %p1375_p7  ;;  %p1221_p0 = por %p1220_p13, %p1219_p12 }
  0x67   : > { %p1215_p11 = pneg %p1214_p10 }
  0x69   : > { %p1222_p2 = pnand %p1221_p0, %p1215_p11 }
  0x6b   : > { %1225 = shalt.err (!%p1222_p2)
}
  0x6c   : > { %s1277_s12 = smov [#allocation13]   ;;  %p1721_p3 = scmp.ne.s32.totalorder %s1718_s17, 0 }
  0x6d   : > { %1057 = dma.vmem_to_smem (!%p1369_p5), %s356_s28, 16, %s1277_s12, [#allocation14]  }
  0x6e   : > { %379 = sbr.rel (%p1721_p3) target bundleno = 195 (0xc3), region = 56  ;;  %p1722_p1 = scmp.ne.s32.totalorder (!%p1721_p3), %s1717_s16, 0 }
  0x75   : > { %1239 = dma.done.wait (%p1722_p1), [#allocation3], 64  }
  0x76   : > { %1241 = vsyncadd (%p1722_p1), [#allocation3], 4294967232 }
  0x77   : > { %1243 = dma.done.wait (%p1722_p1), [#allocation5], 80  }
  0x78   : > { %1245 = vsyncadd (%p1722_p1), [#allocation5], 4294967216 }
  0x79   : > { %1247 = dma.done.wait (%p1722_p1), [#allocation8], 80  }
  0x7a   : > { %1249 = vsyncadd (%p1722_p1), [#allocation8], 4294967216 }
  0x7b   : > { %1251 = dma.done.wait (%p1722_p1), [#allocation11], 80  }
  0x7c   : > { %1253 = vsyncadd (%p1722_p1), [#allocation11], 4294967216 }
  0x7d   : > { %1255 = dma.done.wait (%p1722_p1), [#allocation14], 16  }
  0x7e   : > { %1257 = vsyncadd (%p1722_p1), [#allocation14], 4294967280 }
  0x7f   : > { %413 = sfence }
  0x80   : > { %p450_p5 = scmp.lt.s32.totalorder %s1260_s30, 1  ;;  %s471_s17 = sld [smem:[#allocation2]] }
  0x81   : > { %s933_s24 = sld [smem:[#allocation2 + $0x80]]  ;;  %s935_s15 = sld [smem:[#allocation2 + $0x1]] }
  0x82   : > { %s934_s26 = sld [smem:[#allocation2 + $0x100]]  ;;  %s1730_s30 = smov (!%p450_p5, %s1260_s30), 1 }
  0x83   : > { %s1460_s13 = sld [smem:[#allocation4]]  ;;  %s1715_s18 = smul.u32 6, %s1730_s30 }
  0x84   : > { %s936_s19 = sld [smem:[#allocation2 + $0x81]]  ;;  %s1723_s0 = sld [smem:[#allocation20_spill]] }
  0x85   : > { %s937_s20 = sld [smem:[#allocation2 + $0x101]]  ;;  %s939_s23 = sld [smem:[#allocation2 + $0x2]] }
  0x86   : > { %v472_v0 = vstv %s471_s17  ;;  %s1468_s25 = sld [smem:[#allocation4 + $0x1]]  ;;  %s940_s27 = sld [smem:[#allocation2 + $0x82]] }
  0x87   : > { %v475_v4 = vstv %s933_s24  ;;  %v487_v9 = vstv %s935_s15  ;;  %s1479_s28 = sld [smem:[#allocation2 + $0x102]]  ;;  %s1484_s12 = sld [smem:[#allocation2 + $0x3]] }
  0x88   : > { %v479_v7 = vstv %s934_s26  ;;  %s1481_s29 = sld [smem:[#allocation4 + $0x2]]  ;;  %s1486_s17 = sld [smem:[#allocation2 + $0x83]] }
  0x89   : > { %v483_v13 = vstv %s1460_s13  ;;  %s1490_s24 = sld [smem:[#allocation2 + $0x103]]  ;;  %s1495_s15 = sld [smem:[#allocation6]] }
  0x8a   : > { %s457_s22 = scalar_lea.vmem %s1723_s0, %s1715_s18  ;;  %v490_v12 = vstv %s936_s19  ;;  %s1492_s26 = sld [smem:[#allocation4 + $0x3]] }
  0x8b   : > { %v1470_v1 = vld [vmem:[%s457_s22] sm:$0x3]  ;;  %v1472_v2 = vld [vmem:[%s457_s22 + $0x2] sm:$0x3]  ;;  %v1474_v3 = vld [vmem:[%s457_s22 + $0x4] sm:$0x3]  ;;  %v494_v15 = vstv %s937_s20 }
  0x8c   : > { %v473_v5 = vmul.f32 %v472_v0, %v1470_v1  ;;  %v476_v6 = vmul.f32 %v1472_v2, %v475_v4  ;;  %v480_v8 = vmul.f32 %v1474_v3, %v479_v7  ;;  %v488_v11 = vmul.f32 %v487_v9, %v1470_v1  ;;  %s1497_s19 = sld [smem:[#allocation6 + $0x80]]  ;;  %s1506_s21 = sld [smem:[#allocation6 + $0x1]] }
  0x8d   : > { %v491_v14 = vmul.f32 %v1472_v2, %v490_v12  ;;  %v495_v17 = vmul.f32 %v1474_v3, %v494_v15  ;;  %s1499_s16 = sld [smem:[#allocation6 + $0x100]]  ;;  %v498_v20 = vstv %s1468_s25  ;;  %v502_v21 = vstv %s939_s23  ;;  %s1511_s22 = sld [smem:[#allocation6 + $0x81]] }
  0x8e   : > { %v477_v10 = vadd.f32 %v476_v6, %v473_v5  ;;  %s1501_s13 = sld [smem:[#allocation6 + $0x180]]  ;;  %v505_v22 = vstv %s940_s27  ;;  %v503_v24 = vmul.f32 %v502_v21, %v1470_v1  ;;  %v509_v26 = vstv %s1479_s28  ;;  %s1513_s18 = sld [smem:[#allocation6 + $0x101]] }
  0x8f   : > { %v492_v18 = vadd.f32 %v491_v14, %v488_v11  ;;  %s1504_s20 = sld [smem:[#allocation7]]  ;;  %v506_v25 = vmul.f32 %v1472_v2, %v505_v22  ;;  %v510_v28 = vmul.f32 %v1474_v3, %v509_v26  ;;  %v517_v29 = vstv %s1484_s12  ;;  %s1519_s25 = sld [smem:[#allocation6 + $0x181]] }
  0x90   : > { %v481_v16 = vadd.f32 %v480_v8, %v477_v10  ;;  %v518_v32 = vmul.f32 %v517_v29, %v1470_v1  ;;  %v520_v33 = vstv %s1486_s17  ;;  %s1523_s23 = sld [smem:[#allocation6 + $0x2]]  ;;  %v513_v34 = vstv %s1481_s29  ;;  %s1539_s17 = sld [smem:[#allocation7 + $0x1]] }
  0x91   : > { %v496_v23 = vadd.f32 %v495_v17, %v492_v18  ;;  %v507_v31 = vadd.f32 %v506_v25, %v503_v24  ;;  %s1525_s27 = sld [smem:[#allocation6 + $0x82]]  ;;  %v521_v35 = vmul.f32 %v1472_v2, %v520_v33  ;;  %v524_v36 = vstv %s1490_s24  ;;  %s1544_s29 = sld [smem:[#allocation6 + $0x3]] }
  0x92   : > { %v484_v19 = vadd.f32 %v483_v13, %v481_v16  ;;  %v532_v37 = vstv %s1495_s15  ;;  %s1531_s28 = sld [smem:[#allocation6 + $0x102]]  ;;  %v525_v40 = vmul.f32 %v1474_v3, %v524_v36  ;;  %v528_v43 = vstv %s1492_s26  ;;  %s1546_s24 = sld [smem:[#allocation6 + $0x83]] }
  0x93   : > { %v499_v30 = vadd.f32 %v498_v20, %v496_v23  ;;  %s1533_s12 = sld [smem:[#allocation6 + $0x182]]  ;;  %v511_v39 = vadd.f32 %v510_v28, %v507_v31  ;;  %v522_v42 = vadd.f32 %v521_v35, %v518_v32  ;;  %v535_v44 = vstv %s1497_s19  ;;  %s1551_s15 = sld [smem:[#allocation6 + $0x103]] }
  0x94   : > { %v1515_v27 = vmax.f32 %v484_v19, 0.0  ;;  %v539_v45 = vstv %s1499_s16  ;;  %v543_v48 = vstv %s1501_s13  ;;  %v551_v49 = vstv %s1506_s21  ;;  %s1553_s0 = sld [smem:[#allocation6 + $0x183]]  ;;  %s1560_s26 = sld [smem:[#allocation7 + $0x2]] }
  0x95   : > { %v1535_v38 = vmax.f32 %v499_v30, 0.0  ;;  %v514_v46 = vadd.f32 %v513_v34, %v511_v39  ;;  %v526_v50 = vadd.f32 %v525_v40, %v522_v42  ;;  %v554_v52 = vstv %s1511_s22  ;;  %s1565_s19 = sld [smem:[#allocation7 + $0x3]]  ;;  %s1567_s16 = sld [smem:[#allocation9]] }
  0x96   : > { %v533_v41 = vmul.f32 %v532_v37, %v1515_v27  ;;  %v552_v51 = vmul.f32 %v551_v49, %v1515_v27  ;;  %v558_v53 = vstv %s1513_s18  ;;  %v547_v56 = vstv %s1504_s20  ;;  %s1570_s18 = sld [smem:[#allocation9 + $0x80]]  ;;  %s1579_s21 = sld [smem:[#allocation9 + $0x1]] }
  0x97   : > { %v536_v47 = vmul.f32 %v535_v44, %v1535_v38  ;;  %v515_v54 = vmax.f32 %v514_v46, 0.0  ;;  %v555_v57 = vmul.f32 %v554_v52, %v1535_v38  ;;  %v529_v58 = vadd.f32 %v528_v43, %v526_v50  ;;  %s1572_s13 = sld [smem:[#allocation9 + $0x100]]  ;;  %s1582_s22 = sld [smem:[#allocation9 + $0x81]] }
  0x98   : > { %v562_v59 = vstv %s1519_s25  ;;  %v570_v60 = vstv %s1523_s23  ;;  %v573_v61 = vstv %s1525_s27  ;;  %v577_v7 = vstv %s1531_s28  ;;  %s1577_s20 = sld [smem:[#allocation9 + $0x180]]  ;;  %s1584_s25 = sld [smem:[#allocation9 + $0x101]] }
  0x99   : > { %v537_v55 = vadd.f32 %v536_v47, %v533_v41  ;;  %v540_v62 = vmul.f32 %v539_v45, %v515_v54  ;;  %v556_v63 = vadd.f32 %v555_v57, %v552_v51  ;;  %v559_v0 = vmul.f32 %v558_v53, %v515_v54  ;;  %s1590_s23 = sld [smem:[#allocation10]]  ;;  %s1592_s27 = sld [smem:[#allocation9 + $0x181]] }
  0x9a   : > { %v571_v4 = vmul.f32 %v570_v60, %v1515_v27  ;;  %v530_v5 = vmax.f32 %v529_v58, 0.0  ;;  %v574_v6 = vmul.f32 %v573_v61, %v1535_v38  ;;  %v581_v8 = vstv %s1533_s12  ;;  %s1595_s28 = sld [smem:[#allocation9 + $0x2]] }
  0x9b   : > { %v541_v9 = vadd.f32 %v540_v62, %v537_v55  ;;  %v560_v10 = vadd.f32 %v559_v0, %v556_v63  ;;  %v566_v11 = vstv %s1539_s17  ;;  %v578_v12 = vmul.f32 %v577_v7, %v515_v54  ;;  %s1601_s12 = sld [smem:[#allocation9 + $0x82]] }
  0x9c   : > { %v544_v13 = vmul.f32 %v543_v48, %v530_v5  ;;  %v563_v14 = vmul.f32 %v562_v59, %v530_v5  ;;  %v575_v15 = vadd.f32 %v574_v6, %v571_v4  ;;  %v582_v16 = vmul.f32 %v581_v8, %v530_v5  ;;  %s1604_s17 = sld [smem:[#allocation9 + $0x102]] }
  0x9d   : > { %v589_v17 = vstv %s1544_s29  ;;  %v592_v18 = vstv %s1546_s24  ;;  %v596_v19 = vstv %s1551_s15  ;;  %v600_v20 = vstv %s1553_s0  ;;  %s1599_s0 = sld [smem:[#allocation10 + $0x1]]  ;;  %s1606_s29 = sld [smem:[#allocation9 + $0x182]] }
  0x9e   : > { %v545_v21 = vadd.f32 %v544_v13, %v541_v9  ;;  %v564_v22 = vadd.f32 %v563_v14, %v560_v10  ;;  %v579_v23 = vadd.f32 %v578_v12, %v575_v15  ;;  %v590_v24 = vmul.f32 %v589_v17, %v1515_v27  ;;  %s1611_s24 = sld [smem:[#allocation9 + $0x3]] }
  0x9f   : > { %v585_v25 = vstv %s1560_s26  ;;  %v593_v26 = vmul.f32 %v592_v18, %v1535_v38  ;;  %v597_v28 = vmul.f32 %v596_v19, %v515_v54  ;;  %v601_v29 = vmul.f32 %v600_v20, %v530_v5  ;;  %s1614_s15 = sld [smem:[#allocation9 + $0x83]] }
  0xa0   : > { %v548_v30 = vadd.f32 %v547_v56, %v545_v21  ;;  %v567_v31 = vadd.f32 %v566_v11, %v564_v22  ;;  %v583_v32 = vadd.f32 %v582_v16, %v579_v23  ;;  %v604_v33 = vstv %s1565_s19  ;;  %s1616_s26 = sld [smem:[#allocation9 + $0x103]] }
  0xa1   : > { %v594_v27 = vadd.f32 %v593_v26, %v590_v24  ;;  %v608_v34 = vstv %s1567_s16  ;;  %v611_v35 = vstv %s1570_s18  ;;  %v615_v36 = vstv %s1572_s13  ;;  %s1621_s19 = sld [smem:[#allocation9 + $0x183]]  ;;  %s1625_s16 = sld [smem:[#allocation10 + $0x2]] }
  0xa2   : > { %v549_v37 = vmax.f32 %v548_v30, 0.0  ;;  %v568_v38 = vmax.f32 %v567_v31, 0.0  ;;  %v586_v39 = vadd.f32 %v585_v25, %v583_v32  ;;  %v619_v40 = vstv %s1577_s20  ;;  %s1628_s18 = sld [smem:[#allocation10 + $0x3]]  ;;  %s1631_s13 = sld [smem:[#allocation12]] }
  0xa3   : > { %v598_v41 = vadd.f32 %v597_v28, %v594_v27  ;;  %v627_v42 = vstv %s1579_s21  ;;  %v630_v43 = vstv %s1582_s22  ;;  %v634_v44 = vstv %s1584_s25  ;;  %s1633_s20 = sld [smem:[#allocation12 + $0x80]]  ;;  %s1640_s22 = sld [smem:[#allocation12 + $0x1]] }
  0xa4   : > { %v587_v45 = vmax.f32 %v586_v39, 0.0  ;;  %v609_v46 = vmul.f32 %v608_v34, %v549_v37  ;;  %v612_v47 = vmul.f32 %v611_v35, %v568_v38  ;;  %v628_v48 = vmul.f32 %v627_v42, %v549_v37  ;;  %s1638_s21 = sld [smem:[#allocation12 + $0x100]]  ;;  %s1642_s25 = sld [smem:[#allocation12 + $0x81]] }
  0xa5   : > { %v602_v49 = vadd.f32 %v601_v29, %v598_v41  ;;  %v623_v50 = vstv %s1590_s23  ;;  %v631_v51 = vmul.f32 %v630_v43, %v568_v38  ;;  %v638_v52 = vstv %s1592_s27  ;;  %s1644_s23 = sld [smem:[#allocation12 + $0x101]]  ;;  %s1649_s27 = sld [smem:[#allocation12 + $0x180]] }
  0xa6   : > { %v613_v53 = vadd.f32 %v612_v47, %v609_v46  ;;  %v616_v54 = vmul.f32 %v615_v36, %v587_v45  ;;  %v635_v55 = vmul.f32 %v634_v44, %v587_v45  ;;  %v646_v56 = vstv %s1595_s28  ;;  %s1651_s28 = sld [smem:[#allocation12 + $0x181]] }
  0xa7   : > { %v605_v57 = vadd.f32 %v604_v33, %v602_v49  ;;  %v632_v58 = vadd.f32 %v631_v51, %v628_v48  ;;  %v647_v59 = vmul.f32 %v646_v56, %v549_v37  ;;  %v649_v60 = vstv %s1601_s12  ;;  %s1657_s12 = sld [smem:[#allocation12 + $0x82]] }
  0xa8   : > { %v642_v61 = vstv %s1599_s0  ;;  %v650_v62 = vmul.f32 %v649_v60, %v568_v38  ;;  %v653_v63 = vstv %s1604_s17  ;;  %v657_v0 = vstv %s1606_s29  ;;  %s1654_s0 = sld [smem:[#allocation12 + $0x2]] }
  0xa9   : > { %v606_v4 = vmax.f32 %v605_v57, 0.0  ;;  %v617_v5 = vadd.f32 %v616_v54, %v613_v53  ;;  %v636_v6 = vadd.f32 %v635_v55, %v632_v58  ;;  %v654_v7 = vmul.f32 %v653_v63, %v587_v45  ;;  %s1660_s17 = sld [smem:[#allocation12 + $0x102]] }
  0xaa   : > { %v651_v8 = vadd.f32 %v650_v62, %v647_v59  ;;  %v665_v9 = vstv %s1611_s24  ;;  %v668_v10 = vstv %s1614_s15  ;;  %v672_v11 = vstv %s1616_s26  ;;  %s1662_s29 = sld [smem:[#allocation12 + $0x182]]  ;;  %s1668_s24 = sld [smem:[#allocation13]] }
  0xab   : > { %v620_v12 = vmul.f32 %v619_v40, %v606_v4  ;;  %v639_v13 = vmul.f32 %v638_v52, %v606_v4  ;;  %v658_v14 = vmul.f32 %v657_v0, %v606_v4  ;;  %v666_v15 = vmul.f32 %v665_v9, %v549_v37  ;;  %s1672_s15 = sld [smem:[#allocation13 + $0x1]]  ;;  %s1676_s26 = sld [smem:[#allocation13 + $0x2]] }
  0xac   : > { %v655_v16 = vadd.f32 %v654_v7, %v651_v8  ;;  %v669_v17 = vmul.f32 %v668_v10, %v568_v38  ;;  %v673_v18 = vmul.f32 %v672_v11, %v587_v45  ;;  %v676_v19 = vstv %s1621_s19  ;;  %s1724_s19 = smul.u32 6, %s1730_s30 }
  0xad   : > { %v621_v20 = vadd.f32 %v620_v12, %v617_v5  ;;  %v640_v21 = vadd.f32 %v639_v13, %v636_v6  ;;  %v661_v22 = vstv %s1625_s16  ;;  %v677_v25 = vmul.f32 %v676_v19, %v606_v4 }
  0xae   : > { %v659_v23 = vadd.f32 %v658_v14, %v655_v16  ;;  %v670_v24 = vadd.f32 %v669_v17, %v666_v15  ;;  %v680_v26 = vstv %s1628_s18  ;;  %v684_v30 = vstv %s1631_s13  ;;  %s465_s13 = scalar_lea.vmem %s1711_s9, %s1724_s19 }
  0xaf   : > { %v624_v28 = vadd.f32 %v623_v50, %v621_v20  ;;  %v643_v29 = vadd.f32 %v642_v61, %v640_v21  ;;  %v687_v31 = vstv %s1633_s20  ;;  %v691_v27 = vstv %s1638_s21 }
  0xb0   : > { %v662_v32 = vadd.f32 %v661_v22, %v659_v23  ;;  %v674_v33 = vadd.f32 %v673_v18, %v670_v24  ;;  %v702_v34 = vstv %s1640_s22  ;;  %v705_v37 = vstv %s1642_s25 }
  0xb1   : > { %v625_v35 = vmax.f32 %v624_v28, 0.0  ;;  %v644_v36 = vmax.f32 %v643_v29, 0.0  ;;  %v709_v38 = vstv %s1644_s23  ;;  %v695_v41 = vstv %s1649_s27 }
  0xb2   : > { %v663_v39 = vmax.f32 %v662_v32, 0.0  ;;  %v678_v40 = vadd.f32 %v677_v25, %v674_v33  ;;  %v713_v42 = vstv %s1651_s28  ;;  %v720_v50 = vstv %s1654_s0 }
  0xb3   : > { %v685_v43 = vmul.f32 %v684_v30, %v625_v35  ;;  %v688_v44 = vmul.f32 %v687_v31, %v644_v36  ;;  %v703_v45 = vmul.f32 %v702_v34, %v625_v35  ;;  %v706_v46 = vmul.f32 %v705_v37, %v644_v36 }
  0xb4   : > { %v681_v47 = vadd.f32 %v680_v26, %v678_v40  ;;  %v692_v48 = vmul.f32 %v691_v27, %v663_v39  ;;  %v710_v49 = vmul.f32 %v709_v38, %v663_v39  ;;  %v721_v53 = vmul.f32 %v720_v50, %v625_v35 }
  0xb5   : > { %v689_v51 = vadd.f32 %v688_v44, %v685_v43  ;;  %v707_v52 = vadd.f32 %v706_v46, %v703_v45  ;;  %v723_v54 = vstv %s1657_s12  ;;  %v727_v57 = vstv %s1660_s17 }
  0xb6   : > { %v682_v55 = vmax.f32 %v681_v47, 0.0  ;;  %v724_v56 = vmul.f32 %v723_v54, %v644_v36  ;;  %v731_v58 = vstv %s1662_s29  ;;  %v728_v61 = vmul.f32 %v727_v57, %v663_v39 }
  0xb7   : > { %v693_v59 = vadd.f32 %v692_v48, %v689_v51  ;;  %v711_v60 = vadd.f32 %v710_v49, %v707_v52  ;;  %v699_v5 = vstv %s1668_s24  ;;  %v717_v6 = vstv %s1672_s15 }
  0xb8   : > { %v696_v62 = vmul.f32 %v695_v41, %v682_v55  ;;  %v714_v63 = vmul.f32 %v713_v42, %v682_v55  ;;  %v725_v0 = vadd.f32 %v724_v56, %v721_v53  ;;  %v732_v4 = vmul.f32 %v731_v58, %v682_v55 }
  0xb9   : > { %v735_v10 = vstv %s1676_s26 }
  0xba   : > { %v697_v7 = vadd.f32 %v696_v62, %v693_v59  ;;  %v715_v8 = vadd.f32 %v714_v63, %v711_v60  ;;  %v729_v9 = vadd.f32 %v728_v61, %v725_v0 }
  0xbc   : > { %v700_v11 = vadd.f32 %v699_v5, %v697_v7  ;;  %v718_v12 = vadd.f32 %v717_v6, %v715_v8  ;;  %v733_v13 = vadd.f32 %v732_v4, %v729_v9 }
  0xbe   : > { %v736_v14 = vadd.f32 %v735_v10, %v733_v13  ;;  %v737_v15 = vadd.f32 %v700_v11, %v1470_v1  ;;  %v739_v16 = vadd.f32 %v1472_v2, %v718_v12 }
  0xc0   : > { %738 = vst [vmem:[%s465_s13] sm:$0x3] %v737_v15  ;;  %996 = vst [vmem:[%s465_s13 + $0x2] sm:$0x3] %v739_v16  ;;  %v742_v17 = vadd.f32 %v1474_v3, %v736_v14 }
  0xc2   : > { %997 = vst [vmem:[%s465_s13 + $0x4] sm:$0x3] %v742_v17 }
  0xc3 PF: > { %s24_s11 = sadd.s32 1, %s1268_s11   ;;  %s1725_s30 = smov %s1264_s10 }
  0xc4   : > { %p21_p7 = scmp.ge.s32.totalorder %s24_s11, 4   ;;  %s1726_s10 = smov %s1728_s14 }
  0xc6   :  { %23 = sbr.rel (!%p21_p7) target bundleno = 8 (0x8), region = 123 }
  0xcd   :  { %772 = vsyncpa [#allocation3], 1 }
  0xce   :  { %774 = vsyncpa [#allocation3 + $0x1], 1 }
  0xcf   :  { %775 = vsyncpa [#allocation5], 1 }
  0xd0   :  { %776 = vsyncpa [#allocation8], 1 }
  0xd1   :  { %777 = vsyncpa [#allocation11], 1 }
  0xd2   :  { %778 = vsyncpa [#allocation14], 1 }

</bundles_post_ra>
